<compile_context>
chip_gen: v7x
topology: tpu7x:2x2x1
jax: 0.10.0
libtpu: 0.0.40
codegen_flags: <defaults>
</compile_context>

<pallas_src>
import jax
import jax.numpy as jnp
from jax import lax
from jax.experimental import pallas as pl
from jax.experimental.pallas import tpu as pltpu


_ONEHOT_MAX_PATCHES = 2048   # beyond this the N^2 one-hot stops being worth it
_GATHER_UNROLL = 8


def _onehot_kernel(perm_ref, x_ref, out_ref):
    # perm_ref: VMEM (TB, 1) int32 -- permutation entries for this output row block
    # x_ref:    VMEM (N, D)  f32   -- full patchified image (same block every step)
    # out_ref:  VMEM (TB, D) int8  -- shuffled, clipped patches (uint8 bit pattern)
    tb = out_ref.shape[0]
    n = x_ref.shape[0]
    # Clip + truncate commutes with the patch permutation.  Doing it first makes
    # every matmul operand an exact small integer (0..255 and 0/1), all exactly
    # representable in bf16, so the MXU one-hot gather is bit-exact regardless of
    # the f32 matmul pass count.
    x_int = jnp.clip(x_ref[...], 0.0, 255.0).astype(jnp.int32).astype(jnp.float32)
    cols = lax.broadcasted_iota(jnp.int32, (tb, n), 1)
    onehot = (cols == perm_ref[...]).astype(jnp.float32)          # (TB, N), exact 0/1
    gathered = jnp.dot(onehot, x_int, preferred_element_type=jnp.float32)
    # f32 integer -> int32 (exact) -> int8 (low 8 bits == uint8 value).
    out_ref[...] = gathered.astype(jnp.int32).astype(jnp.int8)


def _gather_kernel(perm_ref, x_ref, out_ref, stage_ref):
    # perm_ref:  SMEM (N,)    int32 -- scalar-prefetched patch permutation
    # x_ref:     VMEM (N, D)  f32   -- full patchified image (same block every step)
    # out_ref:   VMEM (TB, D) int8
    # stage_ref: VMEM (TB, D) f32   -- per-block staging buffer for the row gather
    tb = out_ref.shape[0]
    row0 = pl.program_id(0) * tb

    def copy_row(r):
        src = perm_ref[row0 + r]                 # output patch (row0+r) <- input patch src
        stage_ref[pl.ds(r, 1), :] = x_ref[pl.ds(src, 1), :]

    n_main = (tb // _GATHER_UNROLL) * _GATHER_UNROLL

    def gather_group(g, carry):
        base = g * _GATHER_UNROLL
        # Statically unrolled: 8 independent SMEM reads + row load/store pairs per
        # iteration, so vld/vst can co-issue instead of being loop-control bound.
        for u in range(_GATHER_UNROLL):
            copy_row(base + u)
        return carry

    lax.fori_loop(0, tb // _GATHER_UNROLL, gather_group, 0)
    for r in range(n_main, tb):                  # static remainder (tb % 8 rows)
        copy_row(r)

    v = jnp.clip(stage_ref[...], 0.0, 255.0)
    out_ref[...] = v.astype(jnp.int32).astype(jnp.int8)


def _pick_block_rows(n):
    # Output patch rows handled per grid step.  Prefer a multiple of 32 (full
    # int8 sublane pack) that divides n and leaves >= 2 grid steps so the
    # "parallel" grid axis has work for both v7x TensorCores; else a multiple of
    # 8; else do everything in one step.
    if n <= 32:
        return n
    for mult in (32, 8):
        cands = [c for c in range(mult, min(n // 2, 256) + 1, mult) if n % c == 0]
        if cands:
            return max(cands)
    return n


def _vmem_capacity_bytes():
    try:
        return int(pltpu.get_tpu_info().vmem_capacity_bytes)
    except Exception:
        return 64 << 20   # conservative default: v7x has the smallest per-TC VMEM


def patch_shuffle(img_hwc, perm, patch_size, *, use_onehot=None):
    """PatchShuffle forward; returns the shuffled image as a uint8 (H, W, 3) array.

    `perm` plays the role of the module's np.random.shuffle(np.arange(N)).
    """
    H, W, C = img_hwc.shape
    assert H == W and H % patch_size == 0 and C == 3
    P = patch_size
    h = w = H // P
    N = h * w
    D = P * P * C

    # TODO(synk): when the source image is already uint8 (the module's PIL path),
    # patchify the raw bytes and run a pure byte-row-permutation kernel instead of
    # upcasting to f32 (4x less HBM traffic in the wrapper transpose + kernel read).
    if img_hwc.dtype != jnp.float32:
        img_hwc = img_hwc.astype(jnp.float32)

    # Patchify (layout plumbing in XLA): (H, W, C) -> (N, P*P*C), one contiguous
    # lane-dense row per patch, matching the module's h*w patch ordering.
    slab = (img_hwc.reshape(h, P, w, P, C)
                   .transpose(0, 2, 1, 3, 4)
                   .reshape(N, D))

    perm = perm.astype(jnp.int32)
    if use_onehot is None:
        use_onehot = N <= _ONEHOT_MAX_PATCHES

    TB = _pick_block_rows(N)
    num_blocks = N // TB
    assert TB * num_blocks == N

    # Hardware-aware single-shot VMEM gate (whole f32 slab resident for the gather
    # source; output is only ever (TB, D) blocks).
    cap = _vmem_capacity_bytes()
    slab_bytes = N * D * 4
    if use_onehot:
        vmem_needed = (slab_bytes * 2          # input slab (pipeline buffers)
                       + TB * D * 1 * 2        # int8 output blocks
                       + TB * 1 * 4 * 2        # perm column blocks
                       + TB * N * 4            # one-hot temporary
                       + TB * D * 4            # gathered temporary
                       + (2 << 20))
    else:
        vmem_needed = (slab_bytes * 2
                       + TB * D * 1 * 2
                       + TB * D * 4            # staging scratch
                       + (2 << 20))
    assert vmem_needed <= cap - (4 << 20), "image too large for whole-slab-in-VMEM kernel"
    # TODO(synk): for slabs beyond VMEM, fall back to an HBM-resident slab
    # (memory_space=pl.ANY) with manual per-patch DMA instead of full residency.
    vmem_limit = int(min(cap - (2 << 20), max(32 << 20, vmem_needed)))

    compiler_params = pltpu.CompilerParams(
        # Output row blocks are independent -> parallel grid axis (v7x: 2 TCs split it).
        dimension_semantics=("parallel",),
        vmem_limit_bytes=vmem_limit,
    )

    if use_onehot:
        out_slab_i8 = pl.pallas_call(
            _onehot_kernel,
            out_shape=jax.ShapeDtypeStruct((N, D), jnp.int8),
            grid=(num_blocks,),
            in_specs=[
                pl.BlockSpec((TB, 1), lambda i: (i, 0)),   # perm entries for this row block
                pl.BlockSpec((N, D), lambda i: (0, 0)),    # whole slab, same block every step
            ],
            out_specs=pl.BlockSpec((TB, D), lambda i: (i, 0)),
            compiler_params=compiler_params,
            cost_estimate=pl.CostEstimate(
                flops=2 * N * N * D,
                transcendentals=0,
                bytes_accessed=slab_bytes + N * D + N * 4,
            ),
        )(perm.reshape(N, 1), slab)
    else:
        out_slab_i8 = pl.pallas_call(
            _gather_kernel,
            out_shape=jax.ShapeDtypeStruct((N, D), jnp.int8),
            grid_spec=pltpu.PrefetchScalarGridSpec(
                num_scalar_prefetch=1,                     # perm -> SMEM, also a kernel arg
                grid=(num_blocks,),
                in_specs=[pl.BlockSpec((N, D), lambda i, perm_ref: (0, 0))],
                out_specs=pl.BlockSpec((TB, D), lambda i, perm_ref: (i, 0)),
                scratch_shapes=[pltpu.VMEM((TB, D), jnp.float32)],
            ),
            compiler_params=compiler_params,
            cost_estimate=pl.CostEstimate(
                flops=N * D,
                transcendentals=0,
                bytes_accessed=slab_bytes + N * D + N * 4,
            ),
        )(perm, slab)

    # Free reinterpretation: int8 bits -> uint8 values (same width, no HBM pass).
    out_slab = jax.lax.bitcast_convert_type(out_slab_i8, jnp.uint8)

    # Unpatchify (layout plumbing on uint8).
    out = (out_slab.reshape(h, w, P, P, C)
                   .transpose(0, 2, 1, 3, 4)
                   .reshape(H, W, C))
    # TODO(synk): the original module returns a PIL.Image; we return the uint8 HWC array.
    return out


def _reference(img_hwc, perm, patch_size):
    # Pure-JAX reference mirroring the numpy code in the module.
    H, W, C = img_hwc.shape
    P = patch_size
    h = w = H // P
    x = jnp.transpose(img_hwc.astype(jnp.float32), (2, 0, 1))   # CHW
    x = x.reshape(C, h, P, w, P)
    x = jnp.einsum('chpwq->hwpqc', x).reshape(h * w, P, P, C)
    x = x[perm]
    x = x.reshape(h, w, P, P, C)
    x = jnp.einsum('hwpqc->hpwqc', x).reshape(h * P, w * P, C)
    return jnp.clip(x, 0, 255).astype(jnp.uint8)


if __name__ == "__main__":
    patch_size = 8
    key = jax.random.PRNGKey(0)

    # Cases: (H, use_onehot)
    #   32, None  -> N=16, single-block one-hot MXU path
    #   64, None  -> N=64, TB=32, grid=(2,) one-hot path (exercises the parallel split)
    #   64, False -> same shape, forced 8-way unrolled gather fallback
    cases = [(32, None), (64, None), (64, False)]
    for idx, (H, use_onehot) in enumerate(cases):
        k_img, k_perm = jax.random.split(jax.random.fold_in(key, idx))
        W = H

        # Deterministic input with values spilling outside [0, 255] to exercise the clip.
        img = jax.random.uniform(k_img, (H, W, 3), jnp.float32, -20.0, 275.0)

        # Deterministic patch permutation (stands in for np.random.seed(0)+shuffle).
        n_patches = (H // patch_size) * (W // patch_size)
        perm = jax.random.permutation(k_perm, n_patches).astype(jnp.int32)

        out = jax.block_until_ready(
            patch_shuffle(img, perm, patch_size, use_onehot=use_onehot))
        ref = jax.block_until_ready(_reference(img, perm, patch_size))

        assert out.shape == (H, W, 3) and out.dtype == jnp.uint8
        assert bool(jnp.all(out == ref)), (
            f"mismatch in case {idx} (H={H}, use_onehot={use_onehot})")

    print("KERNEL_OK")
</pallas_src>

<mosaic_0001>
module attributes {stable_mosaic.version = 11 : i64} {
  func.func @_onehot_kernel(%arg0: i32, %arg1: memref<16x1xi32, #tpu.memory_space<vmem>>, %arg2: memref<16x192xf32, #tpu.memory_space<vmem>>, %arg3: memref<16x192xi8, #tpu.memory_space<vmem>>) attributes {dimension_semantics = [#tpu.dimension_semantics<parallel>], iteration_bounds = array<i64: 1>, scalar_prefetch = 0 : i64, scratch_operands = 0 : i64, tpu.core_type = #tpu.core_type<tc>, window_params = [{transform_indices = @transform_0, window_bounds = array<i64: 16, 1>}, {pipeline_mode = #tpu.pipeline_mode<synchronous>, transform_indices = @transform_1, window_bounds = array<i64: 16, 192>}, {transform_indices = @transform_2, window_bounds = array<i64: 16, 192>}]} {
    %c0 = arith.constant 0 : index
    %c0_0 = arith.constant 0 : index
    %0 = vector.load %arg2[%c0, %c0_0] : memref<16x192xf32, #tpu.memory_space<vmem>>, vector<16x192xf32>
    %cst = arith.constant 0.000000e+00 : f32
    %cst_1 = arith.constant 2.550000e+02 : f32
    %1 = vector.broadcast %cst : f32 to vector<16x192xf32>
    %2 = arith.maximumf %1, %0 : vector<16x192xf32>
    %3 = vector.broadcast %cst_1 : f32 to vector<16x192xf32>
    %4 = arith.minimumf %3, %2 : vector<16x192xf32>
    %5 = arith.fptosi %4 : vector<16x192xf32> to vector<16x192xi32>
    %6 = arith.sitofp %5 : vector<16x192xi32> to vector<16x192xf32>
    %7 = tpu.iota {dimensions = array<i32: 1>} : vector<16x16xi32>
    %c0_2 = arith.constant 0 : index
    %c0_3 = arith.constant 0 : index
    %8 = vector.load %arg1[%c0_2, %c0_3] : memref<16x1xi32, #tpu.memory_space<vmem>>, vector<16x1xi32>
    %9 = vector.broadcast %8 : vector<16x1xi32> to vector<16x16xi32>
    %10 = arith.cmpi eq, %7, %9 : vector<16x16xi32>
    %11 = arith.extui %10 : vector<16x16xi1> to vector<16x16xi32>
    %12 = arith.sitofp %11 : vector<16x16xi32> to vector<16x16xf32>
    %cst_4 = arith.constant dense<0.000000e+00> : vector<16x192xf32>
    %13 = tpu.matmul %12, %6, %cst_4 {dimension_numbers = #tpu.dot_dimension_numbers<[1], [0], [0], [1], [0, 0, 1, 1], [], []>} : vector<16x16xf32>, vector<16x192xf32>, vector<16x192xf32> -> vector<16x192xf32>
    %14 = arith.fptosi %13 : vector<16x192xf32> to vector<16x192xi32>
    %15 = arith.trunci %14 : vector<16x192xi32> to vector<16x192xi8>
    %c0_5 = arith.constant 0 : index
    %c0_6 = arith.constant 0 : index
    %16 = vector.load %arg3[%c0_5, %c0_6] : memref<16x192xi8, #tpu.memory_space<vmem>>, vector<16x192xi8>
    tpu.vector_store %arg3[%c0_5, %c0_6], %15 {strides = array<i32>} : memref<16x192xi8, #tpu.memory_space<vmem>>, vector<16x192xi8>,
    return
  }
  func.func @transform_0(%arg0: i32) -> (i32, i32) {
    %c0_i32 = arith.constant 0 : i32
    %c0_i32_0 = arith.constant 0 : i32
    return %arg0, %c0_i32 : i32, i32
  }
  func.func @transform_1(%arg0: i32) -> (i32, i32) {
    %c0_i32 = arith.constant 0 : i32
    %c0_i32_0 = arith.constant 0 : i32
    %c0_i32_1 = arith.constant 0 : i32
    return %c0_i32, %c0_i32_0 : i32, i32
  }
  func.func @transform_2(%arg0: i32) -> (i32, i32) {
    %c0_i32 = arith.constant 0 : i32
    %c0_i32_0 = arith.constant 0 : i32
    return %arg0, %c0_i32 : i32, i32
  }
}

</mosaic_0001>

<bundles_post_ra>
// kernel: tpu_custom_call.1
= control target key start
LH: loop header
LB: loop body
LE: loop exit
PB: predicated region body
PF: predicated region fallthrough
CT: control target
= control target key end

     0   :  { %7 = vsyncpa [#allocation3], 0  ;;  %s312_s0 = inlined_call_operand.vmem [shape: s32[16,1], index: 0, kind: input, shape index: {}]   ;;  %s313_s1 = inlined_call_operand.hbm [shape: f32[16,192], index: 1, kind: input, shape index: {}]   ;;  %s314_s2 = inlined_call_operand.hbm [shape: s8[16,192], index: 2, kind: output, shape index: {}]  }
   0x1   :  { %8 = vsyncpa [#allocation4], 0  ;;  %s259_s9 = smov [#allocation2]   ;;  %s211_s13 = scalar_lea.hbm %s313_s1, 512 }
   0x2   :  { %s16_s10 = sshll.u32 %s259_s9, 4  ;;  %p212_p0 = scmp.ne.s32.totalorder %s313_s1, %s211_s13  ;;  %s17_s10 = int_to_ptr.vmem [resolvable:$true] %s16_s10 }
   0x3   :  { %p215_p1 = scmp.lt.u32.totalorder %s211_s13, %s313_s1 }
   0x5   :  { %p217_p2 = pnand %p215_p1, %p212_p0 }
   0x7   :  { %220 = shalt.err (!%p217_p2)
}
   0x8   :  { %s221_s18 = scalar_lea.vmem %s17_s10, 512  ;;  %p226_p4 = scmp.lt.s32.totalorder %s17_s10, %s17_s10 }
   0x9   :  { %p222_p3 = scmp.ne.s32.totalorder %s17_s10, %s221_s18  ;;  %p227_p5 = scmp.lt.s32.totalorder %s221_s18, %s221_s18 }
   0xb   :  { %p228_p6 = por %p227_p5, %p226_p4 }
   0xd   :  { %p229_p7 = pnand %p228_p6, %p222_p3 }
   0xf   :  { %232 = shalt.err (!%p229_p7)
}
  0x10   :  { %s260_s19 = smov 256   ;;  %s261_s20 = smov 16  }
  0x11   :  { %22 = dma.hbm_to_vmem [thread:$0]  %s313_s1, 512, %s17_s10, [#allocation3], %s260_s19, %s260_s19, %s261_s20  }
  0x12   :  { %255 = dma.done.wait [#allocation3], 512  }
  0x13   :  { %256 = vsyncadd [#allocation3], 4294966784  ;;  %v262_v0 = vmov 0   ;;  %v263_v1 = vmov 0.0   ;;  %v48_v2 = vld [vmem:[%s312_s0] sm:$0xff]  ;;  %v27_v3 = vld [vmem:[#allocation2 + $0x8] sm:$0xff]  ;;  %v46_v30 = vlaneseq }
  0x14   :  { %210 = vset.pattern.permute.xlu0 %v262_v0  ;;  %133 = vmatprep.mubr.f32.mxu0 %v263_v1  ;;  %v29_v4 = vld [vmem:[#allocation2 + $0x18] sm:$0xff]  ;;  %v31_v5 = vmax.f32 %v27_v3, 0.0  ;;  %v26_v6 = vld [vmem:[#allocation2] sm:$0xff]  ;;  %v28_v7 = vld [vmem:[#allocation2 + $0x10] sm:$0xff]  ;;  %vm62_vm0 = vcmask 130048   ;;  %vm154_vm3 = vcmask 1041408  }
  0x15   :  { %139 = vmatprep.mubr.f32.mxu1 %v263_v1  ;;  %51 = vperm.xlu0 %210, %v48_v2   ;;  %v49_v8 = vld [vmem:[%s312_s0 + $0x8] sm:$0xff]  ;;  %v33_v9 = vmax.f32 %v29_v4, 0.0  ;;  %v30_v10 = vmax.f32 %v26_v6, 0.0  ;;  %v32_v11 = vmax.f32 %v28_v7, 0.0  ;;  %v47_v31 = vand.u32 127, %v46_v30  ;;  %s264_s0 = smov [#allocation5]  }
  0x16   :  { %v35_v12 = vmin.f32 %v31_v5, 255.0  ;;  %vm155_vm4 = vcmask 519170   ;;  %s164_s1 = sshll.u32 %s264_s0, 4  ;;  %s165_s1 = int_to_ptr.vmem [resolvable:$true] %s164_s1 }
  0x17   :  { %v37_v13 = vmin.f32 %v33_v9, 255.0  ;;  %v34_v14 = vmin.f32 %v30_v10, 255.0  ;;  %v36_v15 = vmin.f32 %v32_v11, 255.0  ;;  %vm156_vm5 = vmor %vm155_vm4, %vm154_vm3  ;;  %s233_s27 = scalar_lea.vmem %s165_s1, 128  ;;  %p238_p9 = scmp.lt.s32.totalorder %s165_s1, %s165_s1 }
  0x18   :  { %v188_v16 = vtrunc.f32 %v35_v12  ;;  %p234_p8 = scmp.ne.s32.totalorder %s165_s1, %s233_s27  ;;  %p239_p10 = scmp.lt.s32.totalorder %s233_s27, %s233_s27 }
  0x19   :  { %54 = vperm.xlu0 %210, %v49_v8   ;;  %v192_v17 = vtrunc.f32 %v37_v13  ;;  %v186_v18 = vtrunc.f32 %v34_v14  ;;  %v190_v19 = vtrunc.f32 %v36_v15 }
  0x1a   :  { %v189_v20 = vcvt.f32.s32 %v188_v16  ;;  %p240_p11 = por %p239_p10, %p238_p9 }
  0x1b   :  { %v193_v21 = vcvt.f32.s32 %v192_v17  ;;  %v187_v22 = vcvt.f32.s32 %v186_v18  ;;  %v191_v23 = vcvt.f32.s32 %v190_v19 }
  0x1c   :  { %v43_v24 = vcvt.s32.f32 %v189_v20  ;;  %p241_p12 = pnand %p240_p11, %p234_p8 }
  0x1d   :  { %v45_v25 = vcvt.s32.f32 %v193_v21  ;;  %v42_v26 = vcvt.s32.f32 %v187_v22  ;;  %v44_v27 = vcvt.s32.f32 %v191_v23 }
  0x1f   :  { %v180_v28 = vpack.c.bf16 %v45_v25, %v43_v24  ;;  %v182_v29 = vpack.c.bf16 %v44_v27, %v42_v26 }
  0x21   :  { %181 = vmatprep.subr.bf16.mxu0 %v180_v28  ;;  %184 = vmatprep.subr.bf16.mxu1 %v180_v28 }
  0x22   :  { %183 = vmatpush1.bf16.msra.mxu0 %v182_v29  ;;  %185 = vmatpush1.bf16.msra.mxu1 %v182_v29 }
  0x94   :  { %v52_v32 = vpop.permute.xlu0 %51 }
  0x95   :  { %vm56_vm1 = vcmp.eq.s32.totalorder %v47_v31, %v52_v32 }
  0x96   :  { %v176_v33 = vsel %vm56_vm1, 1.0, %v263_v1 }
  0x97   :  { %178 = vmatmul.mubr.msk.f32.vlgmr.msra.gmra.mrb[0].mxu0 %vm62_vm0, %v176_v33 }
  0x98   :  { %v55_v34 = vpop.permute.xlu0 %54 }
  0x99   :  { %vm57_vm2 = vcmp.eq.s32.totalorder %v47_v31, %v55_v34 }
  0x9a   :  { %v177_v35 = vsel %vm57_vm2, 1.0, %v263_v1 }
  0x9b   :  { %179 = vmatmul.mubr.msk.f32.vlgmr.msra.gmra.mrb[0].mxu1 %vm62_vm0, %v177_v35 }
 0x16a   :  { %v135_v36 = vpop.f32.mrb[0].mxu0 }
 0x16b   :  { %v194_v37 = vtrunc.f32 %v135_v36  ;;  %v137_v38 = vpop.f32.mrb[1].mxu0 }
 0x16c   :  { %v196_v39 = vtrunc.f32 %v137_v38 }
 0x16d   :  { %v195_v40 = vcvt.f32.s32 %v194_v37 }
 0x16e   :  { %v197_v41 = vcvt.f32.s32 %v196_v39  ;;  %v141_v42 = vpop.f32.mrb[0].mxu1 }
 0x16f   :  { %v198_v43 = vtrunc.f32 %v141_v42  ;;  %v143_v44 = vpop.f32.mrb[1].mxu1 }
 0x170   :  { %v150_v45 = vpack.c.b16 %v197_v41, %v195_v40  ;;  %v200_v46 = vtrunc.f32 %v143_v44 }
 0x171   :  { %v199_v47 = vcvt.f32.s32 %v198_v43 }
 0x172   :  { %v151_v48 = vpack.c.b8 %v150_v45, %v150_v45  ;;  %v201_v49 = vcvt.f32.s32 %v200_v46 }
 0x174   :  { %157 = vst.msk [vmem:[#allocation5] sm:$0xf] %vm156_vm5, %v151_v48  ;;  %v152_v50 = vpack.c.b16 %v201_v49, %v199_v47 }
 0x176   :  { %v153_v51 = vpack.c.b8 %v152_v50, %v152_v50 }
 0x178   :  { %158 = vst.msk [vmem:[#allocation5 + $0x4] sm:$0xf] %vm156_vm5, %v153_v51 }
 0x179   :  { %244 = shalt.err (!%p241_p12)
}
 0x17a   :  { %s245_s30 = scalar_lea.hbm %s314_s2, 128 }
 0x17b   :  { %p246_p13 = scmp.ne.s32.totalorder %s314_s2, %s245_s30  ;;  %p249_p0 = scmp.lt.u32.totalorder %s245_s30, %s314_s2 }
 0x17d   :  { %p251_p1 = pnand %p249_p0, %p246_p13 }
 0x17f   :  { %254 = shalt.err (!%p251_p1)
}
 0x180   :  { %s265_s7 = smov 64   ;;  %s266_s8 = smov 4  }
 0x181   :  { %170 = dma.vmem_to_hbm [thread:$0]  %s165_s1, 128, %s314_s2, [#allocation4], %s265_s7, %s265_s7, %s266_s8  }
 0x182   :  { %257 = dma.done.wait [#allocation4], 128  }
 0x183   :  { %258 = vsyncadd [#allocation4], 4294967168 }
 0x184   :  { %174 = vsyncpa [#allocation3], 1 }
 0x185   :  { %175 = vsyncpa [#allocation4], 1 }

</bundles_post_ra>
